<compile_context>
chip_gen: v5e
topology: v5e:2x2
jax: 0.10.0
libtpu: 0.0.40
codegen_flags: <defaults>
</compile_context>

<pallas_src>
import math

import jax
import jax.numpy as jnp
from jax import lax
from jax.experimental import pallas as pl
from jax.experimental.pallas import tpu as pltpu

LANE = 128
SUBLANE = 8
SLAB = LANE * SUBLANE                  # 1024 elements = minimal (8,128) slab
MAX_TILE_ROWS = 8192                   # 4 MiB per f32 input block
VMEM_LIMIT_BYTES = 40 * 1024 * 1024
XLA_FALLBACK_NUMEL = SLAB              # raise to ~64K if tiny inputs are common


def _folded_constants(alpha, gamma, beta):
    b = math.e ** (gamma / alpha) - 1.0
    return dict(
        b=b,
        alpha=alpha,
        gamma=gamma,
        beta=beta,
        alpha_over_b=alpha / b,
        b_over_beta=b / beta,               # fold the /beta divide
        large_const=gamma / b - alpha * beta,
    )


def _loss_from_diff_f32(diff, c):
    # diff >= 0 always, so log1p argument >= 0.
    bd = c["b"] * diff
    small = (c["alpha_over_b"] * (bd + 1.0) * jnp.log1p(diff * c["b_over_beta"])
             - c["alpha"] * diff)
    large = c["gamma"] * diff + c["large_const"]
    return jnp.where(diff < c["beta"], small, large)


def _make_sum_kernel(c, rows, tile_rows, total_blocks, blocks_per_core,
                     needs_edge_mask, has_overhang):
    def accumulate(pred_ref, tgt_ref, out_ref, block, masked):
        # bf16 inputs: subtract/abs in bf16, single cast of the diff to f32.
        diff = jnp.abs(pred_ref[...] - tgt_ref[...]).astype(jnp.float32)
        if masked:
            # Only the partial last block pays the iota/compare/select mask,
            # zeroing the Pallas-unspecified padding rows of the edge block.
            row_ids = (lax.broadcasted_iota(jnp.int32, (tile_rows, LANE), 0)
                       + block * tile_rows)
            diff = jnp.where(row_ids < rows, diff, 0.0)
        loss = _loss_from_diff_f32(diff, c)
        # VPU-only partial reduction into the resident (8, 128) accumulator.
        # TODO(synk): confirm in the Mosaic dump that this reshape+sum stays
        # fused with the elementwise producer (no full-block VMEM round-trip,
        # relevant on v5e's single vst slot); else fold via fori_loop strips.
        out_ref[...] += loss.reshape(tile_rows // SUBLANE, SUBLANE, LANE).sum(axis=0)

    def kernel(pred_ref, tgt_ref, out_ref):
        p = pl.program_id(0)   # parallel axis (TensorCore split)
        i = pl.program_id(1)   # arbitrary (accumulation) axis
        block = p * blocks_per_core + i

        @pl.when(i == 0)
        def _():
            out_ref[...] = jnp.zeros_like(out_ref)

        if needs_edge_mask:
            # Interior blocks: unmasked.  Last real block: masked.  The clamped
            # overhang block (block >= total_blocks) matches neither branch and
            # is skipped entirely (no double-count, no wasted VPU/EUP work).
            @pl.when(block < total_blocks - 1)
            def _():
                accumulate(pred_ref, tgt_ref, out_ref, block, masked=False)

            @pl.when(block == total_blocks - 1)
            def _():
                accumulate(pred_ref, tgt_ref, out_ref, block, masked=True)
        elif has_overhang:
            @pl.when(block < total_blocks)
            def _():
                accumulate(pred_ref, tgt_ref, out_ref, block, masked=False)
        else:
            accumulate(pred_ref, tgt_ref, out_ref, block, masked=False)

    return kernel


def _make_elementwise_kernel(c):
    def kernel(pred_ref, tgt_ref, out_ref):
        diff = jnp.abs(pred_ref[...] - tgt_ref[...]).astype(jnp.float32)
        out_ref[...] = _loss_from_diff_f32(diff, c).astype(out_ref.dtype)
    return kernel


def balanced_l1_loss_pallas(pred, target, *, alpha=0.5, gamma=1.5, beta=1.0,
                            reduction="mean", loss_weight=1.0):
    assert beta > 0
    assert pred.shape == target.shape and pred.size > 0
    assert reduction in {"none", "sum", "mean"}

    c = _folded_constants(alpha, gamma, beta)
    orig_shape = pred.shape
    numel = pred.size

    # Tiny-input fast path: pallas_call launch + pad/reshape dominates below
    # one slab; fused XLA is strictly faster there.
    if numel < XLA_FALLBACK_NUMEL:
        diff = jnp.abs(pred - target).astype(jnp.float32)
        loss = _loss_from_diff_f32(diff, c)
        if reduction == "mean":
            return loss_weight * loss.mean()
        if reduction == "sum":
            return loss_weight * loss.sum()
        return loss_weight * loss.astype(pred.dtype)

    p = pred.reshape(-1)
    t = target.reshape(-1)

    # Lane-dense (rows, 128) view with rows a multiple of the sublane count.
    # The reshape is free (no copy) whenever numel % 1024 == 0 (typical NCHW
    # tensors); otherwise we pay a small zero-pad (<= 1023 elems, loss == 0).
    padded = pl.cdiv(numel, SLAB) * SLAB
    if padded != numel:
        # TODO(synk): ragged numel still pays one HBM pad copy; a fully 1-D
        # kernel with element-index masking would remove it.
        p = jnp.pad(p, (0, padded - numel))
        t = jnp.pad(t, (0, padded - numel))
    p = p.reshape(-1, LANE)
    t = t.reshape(-1, LANE)
    rows = p.shape[0]                       # multiple of 8 by construction

    tile_rows = min(rows, MAX_TILE_ROWS)    # multiple of 8 by construction
    total_blocks = pl.cdiv(rows, tile_rows)

    in_bytes = int(p.size) * p.dtype.itemsize + int(t.size) * t.dtype.itemsize

    if reduction == "none":
        kernel = _make_elementwise_kernel(c)
        out2d = pl.pallas_call(
            kernel,
            out_shape=jax.ShapeDtypeStruct((rows, LANE), pred.dtype),
            grid_spec=pltpu.PrefetchScalarGridSpec(
                num_scalar_prefetch=0,
                grid=(total_blocks,),
                in_specs=[pl.BlockSpec((tile_rows, LANE), lambda i: (i, 0)),
                          pl.BlockSpec((tile_rows, LANE), lambda i: (i, 0))],
                out_specs=pl.BlockSpec((tile_rows, LANE), lambda i: (i, 0)),
            ),
            compiler_params=pltpu.CompilerParams(
                dimension_semantics=("parallel",),
                vmem_limit_bytes=VMEM_LIMIT_BYTES,
            ),
            cost_estimate=pl.CostEstimate(
                flops=12 * numel, transcendentals=numel,
                bytes_accessed=in_bytes + rows * LANE * pred.dtype.itemsize),
        )(p, t)
        loss = out2d.reshape(-1)[:numel].reshape(orig_shape)
        return loss_weight * loss

    # 'sum' / 'mean': 2-way row split when there is more than one block (feeds
    # both TensorCores on v7x; harmless on single-core v5e/v6e).  Single-block
    # inputs collapse to a single-core grid (no duplicate pass).
    num_splits = 2 if total_blocks >= 2 else 1
    blocks_per_core = pl.cdiv(total_blocks, num_splits)
    needs_edge_mask = (rows % tile_rows) != 0
    has_overhang = num_splits * blocks_per_core != total_blocks

    kernel = _make_sum_kernel(c, rows, tile_rows, total_blocks, blocks_per_core,
                              needs_edge_mask, has_overhang)

    def in_map(pp, i):
        # Clamp keeps the overhang block's DMA in-bounds; the clamped index
        # equals the previous grid step's block so Pallas skips the re-fetch,
        # and the kernel skips its compute via pl.when.
        return (jnp.minimum(pp * blocks_per_core + i, total_blocks - 1), 0)

    # TODO(synk): on v7x, verify with a profile that the size-`num_splits`
    # "parallel" axis engages both TensorCores; switch to pltpu.CORE_PARALLEL
    # if it does not.
    partials = pl.pallas_call(
        kernel,
        out_shape=jax.ShapeDtypeStruct((num_splits, SUBLANE, LANE), jnp.float32),
        grid_spec=pltpu.PrefetchScalarGridSpec(
            num_scalar_prefetch=0,
            grid=(num_splits, blocks_per_core),
            in_specs=[pl.BlockSpec((tile_rows, LANE), in_map),
                      pl.BlockSpec((tile_rows, LANE), in_map)],
            out_specs=pl.BlockSpec((None, SUBLANE, LANE), lambda pp, i: (pp, 0, 0)),
        ),
        compiler_params=pltpu.CompilerParams(
            dimension_semantics=("parallel", "arbitrary"),
            vmem_limit_bytes=VMEM_LIMIT_BYTES,
        ),
        cost_estimate=pl.CostEstimate(
            flops=12 * numel, transcendentals=numel,
            bytes_accessed=in_bytes + num_splits * SUBLANE * LANE * 4),
    )(p, t)

    total = jnp.sum(partials)               # tiny (num_splits, 8, 128) reduce
    if reduction == "mean":
        total = total / jnp.float32(numel)
    return loss_weight * total


class BalancedL1Loss:
    """JAX/Pallas port of the PyTorch BalancedL1Loss module (forward only)."""

    def __init__(self, alpha=0.5, gamma=1.5, beta=1.0, reduction="mean", loss_weight=1.0):
        assert reduction in {"none", "sum", "mean"}
        self.alpha = alpha
        self.gamma = gamma
        self.beta = beta
        self.reduction = reduction
        self.loss_weight = loss_weight

    def __call__(self, pred, target):
        return balanced_l1_loss_pallas(
            pred, target,
            alpha=self.alpha, gamma=self.gamma, beta=self.beta,
            reduction=self.reduction, loss_weight=self.loss_weight,
        )


def _reference_loss(pred, target, alpha=0.5, gamma=1.5, beta=1.0, reduction="mean"):
    # Matches torch: diff computed in the input dtype, loss in f32.
    diff = jnp.abs(pred - target).astype(jnp.float32)
    b = math.e ** (gamma / alpha) - 1.0
    loss = jnp.where(
        diff < beta,
        alpha / b * (b * diff + 1.0) * jnp.log(b * diff / beta + 1.0) - alpha * diff,
        gamma * diff + gamma / b - alpha * beta,
    )
    if reduction == "mean":
        return loss.mean()
    if reduction == "sum":
        return loss.sum()
    return loss


if __name__ == "__main__":
    key = jax.random.PRNGKey(0)
    keys = jax.random.split(key, 10)

    # Small NCHW shapes consistent with a dense regression target (2048 elems,
    # single-block Pallas path).
    pred = jax.random.normal(keys[0], (2, 4, 16, 16), dtype=jnp.float32)
    target = jax.random.normal(keys[1], (2, 4, 16, 16), dtype=jnp.float32)

    module = BalancedL1Loss(alpha=0.5, gamma=1.5, beta=1.0, reduction="mean", loss_weight=1.0)
    out = jax.block_until_ready(module(pred, target))
    ref = _reference_loss(pred, target, reduction="mean")
    assert jnp.allclose(out, ref, rtol=1e-5, atol=1e-6), (out, ref)

    # 'sum' reduction.
    out_sum = jax.block_until_ready(BalancedL1Loss(reduction="sum")(pred, target))
    ref_sum = _reference_loss(pred, target, reduction="sum")
    assert jnp.allclose(out_sum, ref_sum, rtol=1e-5, atol=1e-4), (out_sum, ref_sum)

    # 'none' reduction (elementwise output).
    out_none = jax.block_until_ready(BalancedL1Loss(reduction="none")(pred, target))
    ref_none = _reference_loss(pred, target, reduction="none")
    assert out_none.shape == pred.shape
    assert jnp.allclose(out_none, ref_none, rtol=1e-5, atol=1e-6)

    # Ragged numel (not a multiple of 1024) exercises the pad path.
    pr = jax.random.normal(keys[2], (3, 5, 7, 11), dtype=jnp.float32)
    tr = jax.random.normal(keys[3], (3, 5, 7, 11), dtype=jnp.float32)
    out_r = jax.block_until_ready(module(pr, tr))
    ref_r = _reference_loss(pr, tr, reduction="mean")
    assert jnp.allclose(out_r, ref_r, rtol=1e-5, atol=1e-6), (out_r, ref_r)

    # Tiny input (< 1024 elems): XLA fast path.
    pt = jax.random.normal(keys[4], (4, 37), dtype=jnp.float32)
    tt = jax.random.normal(keys[5], (4, 37), dtype=jnp.float32)
    out_t = jax.block_until_ready(module(pt, tt))
    ref_t = _reference_loss(pt, tt, reduction="mean")
    assert jnp.allclose(out_t, ref_t, rtol=1e-5, atol=1e-6), (out_t, ref_t)

    # Multi-block with odd block count and a partial edge block (rows = 17184
    # -> blocks of 8192, 8192, 800): exercises the 2-way core split, the
    # overhang-block skip, and the last-block mask.
    pm = jax.random.normal(keys[6], (17184, 128), dtype=jnp.float32)
    tm = jax.random.normal(keys[7], (17184, 128), dtype=jnp.float32)
    out_m = jax.block_until_ready(module(pm, tm))
    ref_m = _reference_loss(pm, tm, reduction="mean")
    assert jnp.allclose(out_m, ref_m, rtol=1e-4, atol=1e-5), (out_m, ref_m)
    out_ms = jax.block_until_ready(BalancedL1Loss(reduction="sum")(pm, tm))
    ref_ms = _reference_loss(pm, tm, reduction="sum")
    assert jnp.allclose(out_ms, ref_ms, rtol=1e-4, atol=1e-1), (out_ms, ref_ms)

    # bf16 inputs: in-kernel bf16 subtract/abs + single f32 cast.
    pb = jax.random.normal(keys[8], (2, 6, 500, 128), dtype=jnp.bfloat16)
    tb = jax.random.normal(keys[9], (2, 6, 500, 128), dtype=jnp.bfloat16)
    out_b = jax.block_until_ready(module(pb, tb))
    ref_b = _reference_loss(pb, tb, reduction="mean")
    assert jnp.allclose(out_b, ref_b, rtol=1e-4, atol=1e-4), (out_b, ref_b)

    print("KERNEL_OK")
</pallas_src>

<mosaic_0001>
module attributes {stable_mosaic.version = 11 : i64} {
  func.func @kernel(%arg0: i32, %arg1: i32, %arg2: memref<16x128xf32, #tpu.memory_space<vmem>>, %arg3: memref<16x128xf32, #tpu.memory_space<vmem>>, %arg4: memref<1x8x128xf32, #tpu.memory_space<vmem>>) attributes {dimension_semantics = [#tpu.dimension_semantics<parallel>, #tpu.dimension_semantics<arbitrary>], iteration_bounds = array<i64: 1, 1>, scalar_prefetch = 0 : i64, scratch_operands = 0 : i64, tpu.core_type = #tpu.core_type<tc>, window_params = [{transform_indices = @transform_0, window_bounds = array<i64: 16, 128>}, {transform_indices = @transform_1, window_bounds = array<i64: 16, 128>}, {transform_indices = @transform_2, window_bounds = array<i64: 1, 8, 128>}]} {
    %c0_i32 = arith.constant 0 : i32
    %0 = arith.cmpi eq, %arg1, %c0_i32 : i32
    %1 = arith.extui %0 : i1 to i32
    %c0_i32_0 = arith.constant 0 : i32
    %2 = arith.cmpi ne, %1, %c0_i32_0 : i32
    scf.if %2 {
      %cst_18 = arith.constant 0.000000e+00 : f32
      %35 = vector.broadcast %cst_18 : f32 to vector<8x128xf32>
      %c0_19 = arith.constant 0 : index
      %c0_20 = arith.constant 0 : index
      %c0_21 = arith.constant 0 : index
      %36 = vector.load %arg4[%c0_19, %c0_20, %c0_21] : memref<1x8x128xf32, #tpu.memory_space<vmem>>, vector<1x8x128xf32>
      %37 = vector.shape_cast %36 : vector<1x8x128xf32> to vector<8x128xf32>
      %38 = vector.shape_cast %35 : vector<8x128xf32> to vector<1x8x128xf32>
      tpu.vector_store %arg4[%c0_19, %c0_20, %c0_21], %38 {strides = array<i32>} : memref<1x8x128xf32, #tpu.memory_space<vmem>>, vector<1x8x128xf32>,
    } else {
    }
    %c0 = arith.constant 0 : index
    %c0_1 = arith.constant 0 : index
    %3 = vector.load %arg2[%c0, %c0_1] : memref<16x128xf32, #tpu.memory_space<vmem>>, vector<16x128xf32>
    %c0_2 = arith.constant 0 : index
    %c0_3 = arith.constant 0 : index
    %4 = vector.load %arg3[%c0_2, %c0_3] : memref<16x128xf32, #tpu.memory_space<vmem>>, vector<16x128xf32>
    %5 = arith.subf %3, %4 : vector<16x128xf32>
    %6 = math.absf %5 : vector<16x128xf32>
    %cst = arith.constant 19.085537 : f32
    %7 = vector.broadcast %cst : f32 to vector<16x128xf32>
    %8 = arith.mulf %7, %6 : vector<16x128xf32>
    %cst_4 = arith.constant 1.000000e+00 : f32
    %9 = vector.broadcast %cst_4 : f32 to vector<16x128xf32>
    %10 = arith.addf %8, %9 : vector<16x128xf32>
    %cst_5 = arith.constant 0.0261978488 : f32
    %11 = vector.broadcast %cst_5 : f32 to vector<16x128xf32>
    %12 = arith.mulf %11, %10 : vector<16x128xf32>
    %cst_6 = arith.constant 19.085537 : f32
    %13 = vector.broadcast %cst_6 : f32 to vector<16x128xf32>
    %14 = arith.mulf %6, %13 : vector<16x128xf32>
    %15 = math.log1p %14 : vector<16x128xf32>
    %16 = arith.mulf %12, %15 : vector<16x128xf32>
    %cst_7 = arith.constant 5.000000e-01 : f32
    %17 = vector.broadcast %cst_7 : f32 to vector<16x128xf32>
    %18 = arith.mulf %17, %6 : vector<16x128xf32>
    %19 = arith.subf %16, %18 : vector<16x128xf32>
    %cst_8 = arith.constant 1.500000e+00 : f32
    %20 = vector.broadcast %cst_8 : f32 to vector<16x128xf32>
    %21 = arith.mulf %20, %6 : vector<16x128xf32>
    %cst_9 = arith.constant -0.421406448 : f32
    %22 = vector.broadcast %cst_9 : f32 to vector<16x128xf32>
    %23 = arith.addf %21, %22 : vector<16x128xf32>
    %cst_10 = arith.constant 1.000000e+00 : f32
    %24 = vector.broadcast %cst_10 : f32 to vector<16x128xf32>
    %25 = arith.cmpf olt, %6, %24 : vector<16x128xf32>
    %26 = arith.select %25, %19, %23 : vector<16x128xi1>, vector<16x128xf32>
    %c0_11 = arith.constant 0 : index
    %c0_12 = arith.constant 0 : index
    %c0_13 = arith.constant 0 : index
    %27 = vector.load %arg4[%c0_11, %c0_12, %c0_13] : memref<1x8x128xf32, #tpu.memory_space<vmem>>, vector<1x8x128xf32>
    %28 = vector.shape_cast %27 : vector<1x8x128xf32> to vector<8x128xf32>
    %29 = vector.shape_cast %26 : vector<16x128xf32> to vector<2x8x128xf32>
    %cst_14 = arith.constant dense<0.000000e+00> : vector<8x128xf32>
    %30 = vector.multi_reduction <add>, %29, %cst_14 [0] : vector<2x8x128xf32> to vector<8x128xf32>
    %31 = arith.addf %28, %30 : vector<8x128xf32>
    %c0_15 = arith.constant 0 : index
    %c0_16 = arith.constant 0 : index
    %c0_17 = arith.constant 0 : index
    %32 = vector.load %arg4[%c0_15, %c0_16, %c0_17] : memref<1x8x128xf32, #tpu.memory_space<vmem>>, vector<1x8x128xf32>
    %33 = vector.shape_cast %32 : vector<1x8x128xf32> to vector<8x128xf32>
    %34 = vector.shape_cast %31 : vector<8x128xf32> to vector<1x8x128xf32>
    tpu.vector_store %arg4[%c0_15, %c0_16, %c0_17], %34 {strides = array<i32>} : memref<1x8x128xf32, #tpu.memory_space<vmem>>, vector<1x8x128xf32>,
    return
  }
  func.func @transform_0(%arg0: i32, %arg1: i32) -> (i32, i32) {
    %c1_i32 = arith.constant 1 : i32
    %0 = arith.muli %arg0, %c1_i32 : i32
    %1 = arith.addi %0, %arg1 : i32
    %c0_i32 = arith.constant 0 : i32
    %2 = arith.minsi %1, %c0_i32 : i32
    %c0_i32_0 = arith.constant 0 : i32
    %c0_i32_1 = arith.constant 0 : i32
    return %2, %c0_i32_0 : i32, i32
  }
  func.func @transform_1(%arg0: i32, %arg1: i32) -> (i32, i32) {
    %c1_i32 = arith.constant 1 : i32
    %0 = arith.muli %arg0, %c1_i32 : i32
    %1 = arith.addi %0, %arg1 : i32
    %c0_i32 = arith.constant 0 : i32
    %2 = arith.minsi %1, %c0_i32 : i32
    %c0_i32_0 = arith.constant 0 : i32
    %c0_i32_1 = arith.constant 0 : i32
    return %2, %c0_i32_0 : i32, i32
  }
  func.func @transform_2(%arg0: i32, %arg1: i32) -> (i32, i32, i32) {
    %c0_i32 = arith.constant 0 : i32
    %c0_i32_0 = arith.constant 0 : i32
    %c0_i32_1 = arith.constant 0 : i32
    return %arg0, %c0_i32, %c0_i32_0 : i32, i32, i32
  }
}

</mosaic_0001>

<bundles_post_ra>
// kernel: tpu_custom_call.1
= control target key start
LH: loop header
LB: loop body
LE: loop exit
PB: predicated region body
PF: predicated region fallthrough
CT: control target
= control target key end

     0   :  { %7 = vsyncpa [#allocation3], 0  ;;  %s258_s0 = inlined_call_operand.hbm [shape: f32[16,128], index: 0, kind: input, shape index: {}]   ;;  %s259_s1 = inlined_call_operand.hbm [shape: f32[16,128], index: 1, kind: input, shape index: {}]   ;;  %s260_s2 = inlined_call_operand.hbm [shape: f32[1,8,128], index: 2, kind: output, shape index: {}]  }
   0x1   :  { %8 = vsyncpa [#allocation6], 0 }
   0x2   :  { %9 = vsyncpa [#allocation4], 0  ;;  %s20_s11 = sshll.u32 %s258_s0, 4  ;;  %s229_s12 = smov [#allocation2]   ;;  %s21_s11 = int_to_ptr.hbm [resolvable:$true] %s20_s11 }
   0x3   :  { %s22_s13 = sshll.u32 %s229_s12, 4  ;;  %s39_s16 = sshll.u32 %s259_s1, 4  ;;  %s23_s13 = int_to_ptr.vmem [resolvable:$true] %s22_s13  ;;  %s40_s16 = int_to_ptr.hbm [resolvable:$true] %s39_s16 }
   0x4   :  { %s230_s17 = smov 128   ;;  %s231_s18 = smov 8  }
   0x5   :  { %28 = dma.hbm_to_vmem [thread:$0]  %s21_s11, 256, %s23_s13, [#allocation3], %s230_s17, %s230_s17, %s231_s18  }
   0x6   :  { %s232_s19 = smov [#allocation5]  }
   0x7   :  { %s41_s20 = sshll.u32 %s232_s19, 4  ;;  %s42_s20 = int_to_ptr.vmem [resolvable:$true] %s41_s20 }
   0x8   :  { %47 = dma.hbm_to_vmem [thread:$0]  %s40_s16, 256, %s42_s20, [#allocation6], %s230_s17, %s230_s17, %s231_s18  }
   0x9   :  { %223 = dma.done.wait [#allocation3], 256  }
   0xa   :  { %224 = vsyncadd [#allocation3], 4294967040 }
   0xb   :  { %225 = dma.done.wait [#allocation6], 256  }
   0xc   :  { %226 = vsyncadd [#allocation6], 4294967040  ;;  %v69_v0 = vld [vmem:[#allocation2] sm:$0xff]  ;;  %v70_v1 = vld [vmem:[#allocation2 + $0x8] sm:$0xff]  ;;  %s233_s0 = smov [#allocation7]   ;;  %s126_s23 = sshll.u32 %s260_s2, 4  ;;  %s127_s23 = int_to_ptr.hbm [resolvable:$true] %s126_s23 }
   0xd   :  { %v71_v2 = vld [vmem:[#allocation5] sm:$0xff]  ;;  %v72_v3 = vld [vmem:[#allocation5 + $0x8] sm:$0xff]  ;;  %s124_s1 = sshll.u32 %s233_s0, 4  ;;  %s125_s1 = int_to_ptr.vmem [resolvable:$true] %s124_s1 }
   0xe   :  { %v73_v4 = vsub.f32 %v69_v0, %v71_v2  ;;  %v74_v5 = vsub.f32 %v70_v1, %v72_v3 }
  0x10   :  { %v75_v6 = vand.u32 2147483647, %v73_v4  ;;  %v76_v7 = vand.u32 2147483647, %v74_v5 }
  0x12   :  { %v77_v8 = vmul.f32 19.085537, %v75_v6  ;;  %v78_v9 = vmul.f32 19.085537, %v76_v7  ;;  %v107_v19 = vmul.f32 1.5, %v75_v6  ;;  %v108_v23 = vmul.f32 1.5, %v76_v7 }
  0x13   :  { %v103_v28 = vmul.f32 0.5, %v75_v6  ;;  %v104_v30 = vmul.f32 0.5, %v76_v7  ;;  %vm111_vm2 = vcmp.lt.f32.partialorder %v75_v6, 1.0  ;;  %vm112_vm3 = vcmp.lt.f32.partialorder %v76_v7, 1.0 }
  0x14   :  { %v79_v10 = vadd.f32 1.0, %v77_v8  ;;  %v86_v11 = vmul.f32 -0.5, %v77_v8  ;;  %v80_v12 = vadd.f32 1.0, %v78_v9  ;;  %v95_v13 = vmul.f32 -0.5, %v78_v9 }
  0x15   :  { %v89_v15 = vand.u32 2147483647, %v77_v8  ;;  %v98_v17 = vand.u32 2147483647, %v78_v9  ;;  %v109_v33 = vadd.f32 -0.42140645, %v107_v19 }
  0x16   :  { %147 = vlog2.f32 %v79_v10  ;;  %v87_v14 = vadd.f32 1.0, %v86_v11  ;;  %v96_v16 = vadd.f32 1.0, %v95_v13  ;;  %v81_v21 = vmul.f32 0.026197849, %v79_v10 }
  0x17   :  { %149 = vlog2.f32 %v80_v12  ;;  %vm90_vm0 = vcmp.lt.f32.partialorder %v89_v15, 0.0004427343  ;;  %v82_v25 = vmul.f32 0.026197849, %v80_v12  ;;  %vm99_vm1 = vcmp.lt.f32.partialorder %v98_v17, 0.0004427343 }
  0x18   :  { %v88_v18 = vmul.f32 %v87_v14, %v77_v8  ;;  %v97_v22 = vmul.f32 %v96_v16, %v78_v9  ;;  %v110_v35 = vadd.f32 -0.42140645, %v108_v23 }
  0x1c   :  { %v148_v20 = vpop.eup %147 }
  0x1d   :  { %v150_v24 = vpop.eup %149  ;;  %v85_v26 = vmul.f32 0.6931472, %v148_v20 }
  0x1e   :  { %v94_v27 = vmul.f32 0.6931472, %v150_v24 }
  0x1f   :  { %v91_v29 = vsel %vm90_vm0, %v88_v18, %v85_v26 }
  0x20   :  { %v100_v31 = vsel %vm99_vm1, %v97_v22, %v94_v27  ;;  %v101_v32 = vmul.f32 %v91_v29, %v81_v21 }
  0x21   :  { %v102_v34 = vmul.f32 %v100_v31, %v82_v25 }
  0x22   :  { %v105_v36 = vsub.f32 %v101_v32, %v103_v28 }
  0x23   :  { %v106_v37 = vsub.f32 %v102_v34, %v104_v30 }
  0x24   :  { %v113_v38 = vsel %vm111_vm2, %v105_v36, %v109_v33 }
  0x25   :  { %v114_v39 = vsel %vm112_vm3, %v106_v37, %v110_v35 }
  0x26   :  { %v116_v40 = vadd.f32 %v114_v39, %v113_v38 }
  0x28   :  { %118 = vst [vmem:[#allocation7] sm:$0xff] %v116_v40 }
  0x29   :  { %129 = dma.vmem_to_hbm [thread:$0]  %s125_s1, 128, %s127_s23, [#allocation4]  }
  0x2a   :  { %227 = dma.done.wait [#allocation4], 128  }
  0x2b   :  { %228 = vsyncadd [#allocation4], 4294967168 }
  0x2c   :  { %134 = vsyncpa [#allocation3], 1 }
  0x2d   :  { %135 = vsyncpa [#allocation6], 1 }
  0x2e   :  { %136 = vsyncpa [#allocation4], 1 }

</bundles_post_ra>
